<compile_context>
chip_gen: v6e
topology: v6e:2x2x1
jax: 0.10.0
libtpu: 0.0.40
codegen_flags: <defaults>
</compile_context>

<pallas_src>
import functools

import jax
import jax.numpy as jnp
from jax import lax
from jax.experimental import pallas as pl
from jax.experimental.pallas import tpu as pltpu


_CONV_WEIGHTS = ("we_cat", "we_rad", "we2", "be2", "wp1", "bp1", "wp2_row",
                 "wf1_m", "bf1", "wf2", "bf2")


def _silu(x):
    # x * sigmoid(x) with a single EUP transcendental: sigmoid(x) = 0.5*(1+tanh(x/2)).
    h = 0.5 * x
    return h * (jnp.tanh(h) + 1.0)


def _full_spec(arr):
    assert arr.ndim == 2
    return pl.BlockSpec(arr.shape, lambda i: (0, 0))


# --------------------------------------------------------------------------- #
# Tiny single-block linear kernel: in_embed and the hoisted per-layer
# d_src = feats @ we_src + be1 (destination-invariant, computed once per layer).
# --------------------------------------------------------------------------- #
def _linear_kernel(x_ref, w_ref, b_ref, o_ref):
    o_ref[...] = (jnp.dot(x_ref[...], w_ref[...],
                          preferred_element_type=jnp.float32)
                  + b_ref[...]).astype(o_ref.dtype)


def pallas_linear(x, w, b):
    # TODO(synk): tile over rows for very large N; single block is fine here.
    n = x.shape[0]
    out_dim = w.shape[1]
    return pl.pallas_call(
        _linear_kernel,
        grid=(1,),
        in_specs=[_full_spec(x), _full_spec(w), _full_spec(b)],
        out_specs=pl.BlockSpec((n, out_dim), lambda i: (0, 0)),
        out_shape=jax.ShapeDtypeStruct((n, out_dim), jnp.bfloat16),
    )(x, w, b)


# --------------------------------------------------------------------------- #
# One EquiCoordGraphConv layer (edge MLP + position MLP + feature MLP),
# tiled over destination nodes (grid axis "parallel").
# --------------------------------------------------------------------------- #
def _egnn_conv_kernel(feats_ref, pos_ref, pos_t_ref, adj_ref, d_src_ref,
                      we_cat_ref, we_rad_ref, we2_ref, be2_ref,
                      wp1_ref, bp1_ref, wp2_ref,
                      wf1m_ref, bf1_ref, wf2_ref, bf2_ref,
                      feats_out_ref, pos_out_ref,
                      *, t_dst, m1, residual, normalize, tanh, out_activation):
    n_src = pos_ref.shape[0]
    t = t_dst
    off = pl.multiple_of(pl.program_id(0) * t, t)

    feats_d = feats_ref[...]                                   # [T, H] bf16
    pos_s = pos_ref[...]                                       # [N, 3] f32
    pos_d = pos_ref[pl.ds(off, t), :]                          # [T, 3] f32
    pos_t = pos_t_ref[...]                                     # [3, N] f32
    adj = adj_ref[...]                                         # [T, N] bf16

    # ---- radial: exact squared distance, built from lane-dense [T, N] slabs ----
    radial = jnp.zeros((t, n_src), jnp.float32)
    for c in range(3):
        diff_c = pos_d[:, c:c + 1] - pos_t[c:c + 1, :]         # [T, N]
        radial = radial + diff_c * diff_c

    # ---- dst-side projection: edge-MLP dst term + feature-MLP h term, one dot ----
    dcat = jnp.dot(feats_d, we_cat_ref[...],
                   preferred_element_type=jnp.float32)         # [T, M1+F1]
    d_dst = dcat[:, :m1].astype(jnp.bfloat16)                  # [T, M1]
    h_feat = dcat[:, m1:]                                      # [T, F1] f32

    # ---- edge MLP layer 1 over [h_dst, h_src, radial]; d_src carries be1 ----
    d_src = d_src_ref[...]                                     # [N, M1] bf16
    radial_b = radial.astype(jnp.bfloat16)
    pre1 = (d_dst[:, None, :] + d_src[None, :, :]
            + radial_b[:, :, None] * we_rad_ref[...].reshape(1, 1, m1))  # bf16
    h_e = _silu(pre1).reshape(t * n_src, m1)                   # [T*N, M1] bf16

    # ---- edge MLP layer 2 (activate_last=True) ----
    msg = _silu((jnp.dot(h_e, we2_ref[...],
                         preferred_element_type=jnp.float32)
                 + be2_ref[...]).astype(jnp.bfloat16))          # [T*N, M] bf16

    # ---- position MLP -> per-edge scalar weight ----
    p1v = _silu((jnp.dot(msg, wp1_ref[...],
                         preferred_element_type=jnp.float32)
                 + bp1_ref[...]).astype(jnp.bfloat16))          # [T*N, P1] bf16
    p1v3 = p1v.reshape(t, n_src, -1)
    w = jnp.sum((p1v3 * wp2_ref[...].reshape(1, 1, -1)).astype(jnp.float32),
                axis=-1)                                        # [T, N] f32
    if tanh:
        w = jnp.tanh(w)
    aw = adj.astype(jnp.float32) * w                            # mask non-edges
    if normalize:
        aw = aw * lax.rsqrt(radial + 1e-16)                     # ~ 1/(sqrt(r)+1e-8)

    # ---- coordinate update: sum_s aw[d,s] * (x_d - x_s) via row-sum + matmul ----
    row_sum = jnp.sum(aw, axis=-1, keepdims=True)               # [T, 1]
    pos_new = pos_d + row_sum * pos_d - jnp.dot(
        aw, pos_s, preferred_element_type=jnp.float32)          # [T, 3] f32

    # ---- feature aggregation (mask + sublane reduce) + feature MLP ----
    msg3 = msg.reshape(t, n_src, -1)
    agg = jnp.sum((msg3 * adj[:, :, None]).astype(jnp.float32), axis=1)  # [T, M]
    h1 = _silu(h_feat
               + jnp.dot(agg.astype(jnp.bfloat16), wf1m_ref[...],
                         preferred_element_type=jnp.float32)
               + bf1_ref[...])                                  # [T, F1] f32
    out = jnp.dot(h1.astype(jnp.bfloat16), wf2_ref[...],
                  preferred_element_type=jnp.float32) + bf2_ref[...]
    if residual:
        out = feats_d.astype(jnp.float32) + out
    if out_activation:                                          # activation between layers
        out = _silu(out)

    feats_out_ref[...] = out.astype(feats_out_ref.dtype)
    pos_out_ref[...] = pos_new.astype(pos_out_ref.dtype)


# --------------------------------------------------------------------------- #
# Generation-aware tiling (VMEM budget from the actual chip).
# --------------------------------------------------------------------------- #
def _vmem_capacity_bytes():
    try:
        return int(pltpu.get_tpu_info().vmem_capacity_bytes)
    except Exception:
        return 64 * 1024 * 1024  # conservative (v7x-sized) fallback


def _tiling_config(n, m1, m, p1):
    cap = _vmem_capacity_bytes()
    if cap >= 100 * 1024 * 1024:       # v5e / v6e (128 MiB VMEM)
        budget, limit = 40 * 1024 * 1024, 96 * 1024 * 1024
    else:                              # v7x (64 MiB) or unknown
        budget, limit = 16 * 1024 * 1024, 48 * 1024 * 1024
    # bf16 pre1 + h_e, f32 we2-out, bf16 msg + masked copy, f32 agg temp,
    # f32 wp1-out, bf16 p1v + product, plus small [T,N] f32 maps.
    per_edge = 4 * m1 + 10 * m + 8 * p1 + 48
    # Cap at n // 2 so the "parallel" dst axis keeps >= 2 steps (v7x megacore).
    candidates = [c for c in (256, 128, 64, 32, 16, 8) if c < n and n % c == 0]
    t = next((c for c in candidates if c * n * per_edge <= budget), None)
    if t is None:
        t = candidates[-1] if candidates else n
    return t, limit


def egnn_conv(feats, pos, adj, d_src, lp, *, residual, normalize, tanh,
              out_activation, t_dst, vmem_limit):
    n, h = feats.shape
    m1 = lp["we_rad"].shape[1]
    h_out = lp["wf2"].shape[1]
    pos_t = jnp.transpose(pos)                                  # [3, N] layout plumbing
    weights = tuple(lp[k] for k in _CONV_WEIGHTS)

    grid = (n // t_dst,)
    in_specs = [pl.BlockSpec((t_dst, h), lambda i: (i, 0)),     # feats (dst tile)
                _full_spec(pos), _full_spec(pos_t),
                pl.BlockSpec((t_dst, n), lambda i: (i, 0)),     # adj (dst rows)
                _full_spec(d_src)]
    in_specs += [_full_spec(wgt) for wgt in weights]
    out_specs = (pl.BlockSpec((t_dst, h_out), lambda i: (i, 0)),
                 pl.BlockSpec((t_dst, 3), lambda i: (i, 0)))
    out_shape = (jax.ShapeDtypeStruct((n, h_out), jnp.bfloat16),
                 jax.ShapeDtypeStruct((n, 3), jnp.float32))

    kernel = functools.partial(
        _egnn_conv_kernel, t_dst=t_dst, m1=m1, residual=residual,
        normalize=normalize, tanh=tanh, out_activation=out_activation)

    return pl.pallas_call(
        kernel,
        grid=grid,
        in_specs=in_specs,
        out_specs=out_specs,
        out_shape=out_shape,
        compiler_params=pltpu.CompilerParams(
            dimension_semantics=("parallel",),
            vmem_limit_bytes=vmem_limit),
    )(feats, pos, pos_t, adj, d_src, *weights)


# --------------------------------------------------------------------------- #
# Parameter init (deterministic, synthetic) and full forward
# --------------------------------------------------------------------------- #
def _init_linear(key, fan_in, fan_out, bias=True):
    kw, kb = jax.random.split(key)
    w = jax.random.normal(kw, (fan_in, fan_out), jnp.float32) / jnp.sqrt(
        jnp.float32(fan_in))
    b = 0.01 * jax.random.normal(kb, (1, fan_out), jnp.float32) if bias else None
    return w, b


def init_conv_params(key, h, m1, m, p1, f1):
    ks = jax.random.split(key, 6)
    we1, be1 = _init_linear(ks[0], 2 * h + 1, m1)    # edge MLP 1 over [h_dst,h_src,radial]
    we2, be2 = _init_linear(ks[1], m1, m)
    wp1, bp1 = _init_linear(ks[2], m, p1)
    wp2, _ = _init_linear(ks[3], p1, 1, bias=False)
    wf1, bf1 = _init_linear(ks[4], h + m, f1)        # feature MLP 1 over [h, agg]
    wf2, bf2 = _init_linear(ks[5], f1, h)
    bf = jnp.bfloat16
    we_dst, we_src, we_rad = we1[:h], we1[h:2 * h], we1[2 * h:2 * h + 1]
    wf1_h, wf1_m = wf1[:h], wf1[h:]
    return {
        # consumed by the hoisted src projection (be1 folded in there):
        "we_src": we_src.astype(bf), "be1": be1,
        # consumed by the conv kernel:
        "we_cat": jnp.concatenate([we_dst, wf1_h], axis=1).astype(bf),  # [H, M1+F1]
        "we_rad": we_rad.astype(bf),
        "we2": we2.astype(bf), "be2": be2,
        "wp1": wp1.astype(bf), "bp1": bp1, "wp2_row": wp2.T.astype(bf),
        "wf1_m": wf1_m.astype(bf), "bf1": bf1,
        "wf2": wf2.astype(bf), "bf2": bf2,
    }


def egnn_forward(node_feats, positions, adj, params, *, depth, residual=True,
                 normalize=True, tanh=True, activate_last=False):
    # k_linears = 1, use_attention = False, edge_attributes = None
    lp0 = params["layers"][0]
    t_dst, vmem_limit = _tiling_config(
        node_feats.shape[0], lp0["we_rad"].shape[1],
        lp0["we2"].shape[1], lp0["wp1"].shape[1])

    adj_b = adj.astype(jnp.bfloat16)
    feats = pallas_linear(node_feats.astype(jnp.bfloat16),
                          params["w_in"], params["b_in"])       # in_embed (Linear)
    pos = positions
    for i in range(depth):
        lp = params["layers"][i]
        # Hoisted destination-invariant src projection (computed once per layer).
        d_src = pallas_linear(feats, lp["we_src"], lp["be1"])
        out_act = (i < depth - 1) or activate_last
        feats, pos = egnn_conv(
            feats, pos, adj_b, d_src, lp,
            residual=residual, normalize=normalize, tanh=tanh,
            out_activation=out_act, t_dst=t_dst, vmem_limit=vmem_limit)
    return feats, pos


if __name__ == "__main__":
    # Config consistent with EGNN.__init__ (k_linears=1, use_attention=False,
    # edge_attributes_dim=0, activation=SiLU, residual/normalize/tanh=True,
    # activate_last=False).  Feature widths are 128 so matmuls / stores stay
    # lane-dense while the graph itself stays small.
    N, IN_DIM, H = 128, 64, 128
    DEPTH = 2
    M1 = M = P1 = F1 = 128

    key = jax.random.PRNGKey(0)
    k_feat, k_pos, k_emb, k_layers = jax.random.split(key, 4)

    node_feats = jax.random.normal(k_feat, (N, IN_DIM), jnp.float32)
    positions = jax.random.normal(k_pos, (N, 3), jnp.float32)

    # Deterministic directed graph: ring (+/-1) plus a +3 skip, no self loops.
    idx = jnp.arange(N)
    adj = jnp.zeros((N, N), jnp.float32)
    adj = adj.at[idx, (idx + 1) % N].set(1.0)
    adj = adj.at[idx, (idx - 1) % N].set(1.0)
    adj = adj.at[idx, (idx + 3) % N].set(1.0)

    w_in, b_in = _init_linear(k_emb, IN_DIM, H)
    layer_keys = jax.random.split(k_layers, DEPTH)
    params = {
        "w_in": w_in.astype(jnp.bfloat16),
        "b_in": b_in,
        "layers": [init_conv_params(layer_keys[i], H, M1, M, P1, F1)
                   for i in range(DEPTH)],
    }

    feats_out, pos_out = egnn_forward(
        node_feats, positions, adj, params, depth=DEPTH,
        residual=True, normalize=True, tanh=True, activate_last=False,
    )
    jax.block_until_ready((feats_out, pos_out))
    assert feats_out.shape == (N, H) and pos_out.shape == (N, 3)
    assert bool(jnp.all(jnp.isfinite(feats_out.astype(jnp.float32))))
    assert bool(jnp.all(jnp.isfinite(pos_out)))
    print("KERNEL_OK")
</pallas_src>

<mosaic_0001>
module attributes {stable_mosaic.version = 11 : i64} {
  func.func @_linear_kernel(%arg0: i32, %arg1: memref<128x64xbf16, #tpu.memory_space<vmem>>, %arg2: memref<64x128xbf16, #tpu.memory_space<vmem>>, %arg3: memref<1x128xf32, #tpu.memory_space<vmem>>, %arg4: memref<128x128xbf16, #tpu.memory_space<vmem>>) attributes {dimension_semantics = [#tpu.dimension_semantics<arbitrary>], iteration_bounds = array<i64: 1>, scalar_prefetch = 0 : i64, scratch_operands = 0 : i64, tpu.core_type = #tpu.core_type<tc>, window_params = [{pipeline_mode = #tpu.pipeline_mode<synchronous>, transform_indices = @transform_0, window_bounds = array<i64: 128, 64>}, {pipeline_mode = #tpu.pipeline_mode<synchronous>, transform_indices = @transform_1, window_bounds = array<i64: 64, 128>}, {pipeline_mode = #tpu.pipeline_mode<synchronous>, transform_indices = @transform_2, window_bounds = array<i64: 1, 128>}, {pipeline_mode = #tpu.pipeline_mode<synchronous>, transform_indices = @transform_3, window_bounds = array<i64: 128, 128>}]} {
    %c0 = arith.constant 0 : index
    %c0_0 = arith.constant 0 : index
    %0 = vector.load %arg1[%c0, %c0_0] : memref<128x64xbf16, #tpu.memory_space<vmem>>, vector<128x64xbf16>
    %c0_1 = arith.constant 0 : index
    %c0_2 = arith.constant 0 : index
    %1 = vector.load %arg2[%c0_1, %c0_2] : memref<64x128xbf16, #tpu.memory_space<vmem>>, vector<64x128xbf16>
    %cst = arith.constant dense<0.000000e+00> : vector<128x128xf32>
    %2 = tpu.matmul %0, %1, %cst {dimension_numbers = #tpu.dot_dimension_numbers<[1], [0], [0], [1], [0, 0, 1, 1], [], []>} : vector<128x64xbf16>, vector<64x128xbf16>, vector<128x128xf32> -> vector<128x128xf32>
    %c0_3 = arith.constant 0 : index
    %c0_4 = arith.constant 0 : index
    %3 = vector.load %arg3[%c0_3, %c0_4] : memref<1x128xf32, #tpu.memory_space<vmem>>, vector<1x128xf32>
    %4 = vector.broadcast %3 : vector<1x128xf32> to vector<128x128xf32>
    %5 = arith.addf %2, %4 : vector<128x128xf32>
    %6 = arith.truncf %5 : vector<128x128xf32> to vector<128x128xbf16>
    %c0_5 = arith.constant 0 : index
    %c0_6 = arith.constant 0 : index
    %7 = vector.load %arg4[%c0_5, %c0_6] : memref<128x128xbf16, #tpu.memory_space<vmem>>, vector<128x128xbf16>
    tpu.vector_store %arg4[%c0_5, %c0_6], %6 {strides = array<i32>} : memref<128x128xbf16, #tpu.memory_space<vmem>>, vector<128x128xbf16>,
    return
  }
  func.func @transform_0(%arg0: i32) -> (i32, i32) {
    %c0_i32 = arith.constant 0 : i32
    %c0_i32_0 = arith.constant 0 : i32
    %c0_i32_1 = arith.constant 0 : i32
    return %c0_i32, %c0_i32_0 : i32, i32
  }
  func.func @transform_1(%arg0: i32) -> (i32, i32) {
    %c0_i32 = arith.constant 0 : i32
    %c0_i32_0 = arith.constant 0 : i32
    %c0_i32_1 = arith.constant 0 : i32
    return %c0_i32, %c0_i32_0 : i32, i32
  }
  func.func @transform_2(%arg0: i32) -> (i32, i32) {
    %c0_i32 = arith.constant 0 : i32
    %c0_i32_0 = arith.constant 0 : i32
    %c0_i32_1 = arith.constant 0 : i32
    return %c0_i32, %c0_i32_0 : i32, i32
  }
  func.func @transform_3(%arg0: i32) -> (i32, i32) {
    %c0_i32 = arith.constant 0 : i32
    %c0_i32_0 = arith.constant 0 : i32
    %c0_i32_1 = arith.constant 0 : i32
    return %c0_i32, %c0_i32_0 : i32, i32
  }
}

</mosaic_0001>

<bundles_post_ra>
// kernel: tpu_custom_call.1
= control target key start
LH: loop header
LB: loop body
LE: loop exit
PB: predicated region body
PF: predicated region fallthrough
CT: control target
= control target key end

     0   :  { %vm111_vm0 = vcmask 523264   ;;  %s583_s0 = inlined_call_operand.vmem [shape: bf16[128,64], index: 0, kind: input, shape index: {}]   ;;  %s584_s1 = inlined_call_operand.vmem [shape: bf16[64,128], index: 1, kind: input, shape index: {}]   ;;  %s585_s2 = inlined_call_operand.vmem [shape: f32[1,128], index: 2, kind: input, shape index: {}]   ;;  %s586_s3 = inlined_call_operand.hbm [shape: bf16[128,128], index: 3, kind: output, shape index: {}]  }
   0x1   :  { %v476_v0 = vld [vmem:[%s584_s1 + $0x18] sm:$0xff]   ;;  %v477_v1 = vld [vmem:[%s584_s1 + $0x10] sm:$0xff]   ;;  %v478_v2 = vld [vmem:[%s584_s1 + $0x8] sm:$0xff]  }
   0x2   :  { %441 = vmatprep.subr.bf16.mxu0 %v476_v0  ;;  %465 = vmatprep.subr.bf16.mxu1 %v476_v0  ;;  %v480_v3 = vld [vmem:[%s583_s0] sm:$0xff]  }
   0x3   :  { %442 = vmatpush3.bf16.msra.mxu0 %v476_v0  ;;  %469 = vmatpush3.bf16.msra.mxu1 %v476_v0  ;;  %v481_v4 = vld [vmem:[%s583_s0 + $0x20] sm:$0xff]  }
   0x4   :  { %443 = vmatprep.subr.bf16.mxu0 %v477_v1  ;;  %466 = vmatprep.subr.bf16.mxu1 %v477_v1  ;;  %v479_v5 = vld [vmem:[%s584_s1] sm:$0xff]  }
   0x5   :  { %449 = vmatprep.mubr.msk.bf16.mxu0 %vm111_vm0, %v480_v3  ;;  %457 = vmatprep.mubr.msk.bf16.mxu1 %vm111_vm0, %v481_v4 }
   0x7   :  { %444 = vmatpush3.bf16.msra.mxu0 %v477_v1  ;;  %470 = vmatpush3.bf16.msra.mxu1 %v477_v1 }
   0x8   :  { %445 = vmatprep.subr.bf16.mxu0 %v478_v2  ;;  %467 = vmatprep.subr.bf16.mxu1 %v478_v2 }
   0xb   :  { %446 = vmatpush3.bf16.msra.mxu0 %v478_v2  ;;  %471 = vmatpush3.bf16.msra.mxu1 %v478_v2 }
   0xc   :  { %447 = vmatprep.subr.bf16.mxu0 %v479_v5  ;;  %468 = vmatprep.subr.bf16.mxu1 %v479_v5 }
   0xd   :  { %8 = vsyncpa [#allocation3], 0  ;;  %v482_v6 = vld [vmem:[%s583_s0 + $0x8] sm:$0xff]   ;;  %v484_v8 = vld [vmem:[%s583_s0 + $0x10] sm:$0xff]  }
   0xe   :  { %v483_v7 = vld [vmem:[%s583_s0 + $0x28] sm:$0xff]   ;;  %v485_v9 = vld [vmem:[%s583_s0 + $0x30] sm:$0xff]   ;;  %v486_v10 = vld [vmem:[%s583_s0 + $0x18] sm:$0xff]  }
   0xf   :  { %448 = vmatpush3.bf16.msra.mxu0 %v479_v5  ;;  %472 = vmatpush3.bf16.msra.mxu1 %v479_v5  ;;  %v487_v11 = vld [vmem:[%s583_s0 + $0x38] sm:$0xff]   ;;  %v329_v14 = vld [vmem:[%s585_s2] ss:$0 sm:$0xff]  ;;  %s510_s0 = smov [#allocation2]  }
  0x10   :  { %s318_s2 = sshll.u32 %s510_s0, 4  ;;  %s319_s2 = int_to_ptr.vmem [resolvable:$true] %s318_s2 }
  0x11   :  { %s488_s10 = scalar_lea.vmem %s319_s2, 1024  ;;  %p493_p1 = scmp.lt.s32.totalorder %s319_s2, %s319_s2 }
  0x12   :  { %450 = vmatmul.mubr.msk.bf16.vlgmr.msra.gmra.mxu0 %vm111_vm0, %v482_v6  ;;  %458 = vmatmul.mubr.msk.bf16.vlgmr.msra.gmra.mxu1 %vm111_vm0, %v483_v7  ;;  %p489_p0 = scmp.ne.s32.totalorder %s319_s2, %s488_s10  ;;  %p494_p2 = scmp.lt.s32.totalorder %s488_s10, %s488_s10 }
  0x13   :  { %453 = vmatprep.mubr.msk.bf16.mxu0 %vm111_vm0, %v484_v8  ;;  %461 = vmatprep.mubr.msk.bf16.mxu1 %vm111_vm0, %v485_v9 }
  0x14   :  { %p495_p3 = por %p494_p2, %p493_p1 }
  0x16   :  { %p496_p4 = pnand %p495_p3, %p489_p0 }
  0x1a   :  { %454 = vmatmul.mubr.msk.bf16.gmra.mxu0 %vm111_vm0, %v486_v10  ;;  %462 = vmatmul.mubr.msk.bf16.gmra.mxu1 %vm111_vm0, %v487_v11 }
  0xd2   :  { %v451_v12 = vpop.f32.mrf.mxu0  ;;  %v459_v13 = vpop.f32.mrf.mxu1 }
  0xd3   :  { %v179_v19 = vadd.f32 %v451_v12, %v329_v14  ;;  %v211_v20 = vadd.f32 %v459_v13, %v329_v14 }
  0xd4   :  { %v170_v15 = vpop.f32.mrf.mxu0  ;;  %v202_v16 = vpop.f32.mrf.mxu1 }
  0xd5   :  { %v171_v23 = vadd.f32 %v329_v14, %v170_v15  ;;  %v203_v24 = vadd.f32 %v329_v14, %v202_v16 }
  0xd6   :  { %v452_v17 = vpop.f32.mrf.mxu0  ;;  %v460_v18 = vpop.f32.mrf.mxu1 }
  0xd7   :  { %v182_v21 = vadd.f32 %v452_v17, %v329_v14  ;;  %v214_v22 = vadd.f32 %v460_v18, %v329_v14 }
  0xd8   :  { %v173_v25 = vpop.f32.mrf.mxu0  ;;  %v205_v26 = vpop.f32.mrf.mxu1 }
  0xd9   :  { %v390_v27 = vpack.c.bf16 %v182_v21, %v179_v19  ;;  %v410_v28 = vpack.c.bf16 %v214_v22, %v211_v20  ;;  %v174_v29 = vadd.f32 %v329_v14, %v173_v25  ;;  %v206_v30 = vadd.f32 %v329_v14, %v205_v26 }
  0xda   :  { %v455_v31 = vpop.f32.mrf.mxu0  ;;  %v463_v32 = vpop.f32.mrf.mxu1 }
  0xdb   :  { %422 = vst [vmem:[#allocation2 + $0x8] sm:$0xff] %v390_v27   ;;  %426 = vst [vmem:[#allocation2 + $0x28] sm:$0xff] %v410_v28   ;;  %v385_v33 = vpack.c.bf16 %v174_v29, %v171_v23  ;;  %v405_v34 = vpack.c.bf16 %v206_v30, %v203_v24  ;;  %v195_v39 = vadd.f32 %v455_v31, %v329_v14 }
  0xdc   :  { %v186_v35 = vpop.f32.mrf.mxu0  ;;  %v218_v36 = vpop.f32.mrf.mxu1  ;;  %v227_v40 = vadd.f32 %v463_v32, %v329_v14 }
  0xdd   :  { %386 = vst [vmem:[#allocation2] sm:$0xff] %v385_v33   ;;  %425 = vst [vmem:[#allocation2 + $0x20] sm:$0xff] %v405_v34   ;;  %v187_v43 = vadd.f32 %v329_v14, %v186_v35  ;;  %v219_v44 = vadd.f32 %v329_v14, %v218_v36 }
  0xde   :  { %v456_v37 = vpop.f32.mrf.mxu0  ;;  %v464_v38 = vpop.f32.mrf.mxu1 }
  0xdf   :  { %v198_v41 = vadd.f32 %v456_v37, %v329_v14  ;;  %v230_v42 = vadd.f32 %v464_v38, %v329_v14 }
  0xe0   :  { %v189_v45 = vpop.f32.mrf.mxu0  ;;  %v221_v46 = vpop.f32.mrf.mxu1 }
  0xe1   :  { %v400_v47 = vpack.c.bf16 %v198_v41, %v195_v39  ;;  %v420_v48 = vpack.c.bf16 %v230_v42, %v227_v40  ;;  %v190_v49 = vadd.f32 %v329_v14, %v189_v45  ;;  %v222_v50 = vadd.f32 %v329_v14, %v221_v46 }
  0xe3   :  { %424 = vst [vmem:[#allocation2 + $0x18] sm:$0xff] %v400_v47   ;;  %428 = vst [vmem:[#allocation2 + $0x38] sm:$0xff] %v420_v48   ;;  %v395_v51 = vpack.c.bf16 %v190_v49, %v187_v43  ;;  %v415_v52 = vpack.c.bf16 %v222_v50, %v219_v44 }
  0xe5   :  { %423 = vst [vmem:[#allocation2 + $0x10] sm:$0xff] %v395_v51   ;;  %427 = vst [vmem:[#allocation2 + $0x30] sm:$0xff] %v415_v52  }
  0xe6   :  { %499 = shalt.err (!%p496_p4)
}
  0xe7   :  { %s511_s11 = smov 64   ;;  %s512_s12 = smov 4  }
  0xe8   :  { %324 = dma.vmem_to_hbm [thread:$0]  %s319_s2, 1024, %s586_s3, [#allocation3], %s511_s11, %s511_s11, %s512_s12  }
  0xe9   :  { %508 = dma.done.wait [#allocation3], 1024  }
  0xea   :  { %509 = vsyncadd [#allocation3], 4294966272 }
  0xeb   :  { %328 = vsyncpa [#allocation3], 1 }

</bundles_post_ra>
